<compile_context>
chip_gen: v7x
topology: tpu7x:2x2x1
jax: 0.10.0
libtpu: 0.0.40
codegen_flags: <defaults>
</compile_context>

<pallas_src>
import functools

import jax
import jax.numpy as jnp
from jax.experimental import pallas as pl
from jax.experimental.pallas import tpu as pltpu


def _round_up(x: int, m: int) -> int:
    return ((x + m - 1) // m) * m


def _divisor_tile(dim_padded: int, requested: int, align: int) -> int:
    """Largest multiple of `align` that divides dim_padded and is <= requested."""
    best = align
    t = align
    limit = min(requested, dim_padded)
    while t <= limit:
        if dim_padded % t == 0:
            best = t
        t += align
    return best


def fc_relu_kernel(x_ref, w_ref, b_ref, o_ref):
    """Grid = (M//tm, N//tn, K//tk); K innermost. Output block is the accumulator."""
    k = pl.program_id(2)

    @pl.when(k == 0)
    def _init():
        o_ref[...] = jnp.zeros_like(o_ref)

    # x tile (tm, tk) bf16 ; W tile (tk, tn) bf16 (canonical K-major layout).
    # MXU bf16 matmul with f32 accumulation straight into the resident output block.
    o_ref[...] += jnp.dot(
        x_ref[...], w_ref[...], preferred_element_type=jnp.float32
    )

    # Epilogue on the last K step: single bias add + ReLU in f32.
    @pl.when(k == pl.num_programs(2) - 1)
    def _epilogue():
        y = o_ref[...] + b_ref[...]            # (1, tn) broadcasts over tm rows
        o_ref[...] = jnp.maximum(y, 0.0).astype(o_ref.dtype)


def prepare_fc_params(weight, bias):
    """One-time (outside the hot path) weight/bias layout prep.

    weight: (out_features, in_features)  PyTorch nn.Linear layout
    bias:   (out_features,)
    returns:
      w_t:   (Kp, Np) bfloat16  -- transposed to (in, out), zero-padded to 128-multiples
      b_row: (1, Np)  float32   -- zero-padded bias row
    """
    N, K = weight.shape
    Kp, Np = _round_up(K, 128), _round_up(N, 128)
    w_t = jnp.zeros((Kp, Np), jnp.bfloat16).at[:K, :N].set(
        weight.T.astype(jnp.bfloat16)
    )
    b_row = jnp.zeros((1, Np), jnp.float32).at[0, :N].set(bias.astype(jnp.float32))
    return w_t, b_row


@functools.partial(jax.jit, static_argnames=("out_features", "tm", "tn", "tk"))
def fc_layer(x, w_t, b_row, *, out_features, tm=512, tn=512, tk=1024):
    """Pallas equivalent of FCLayer.forward (Linear + ReLU).

    x:     (B, in_features) float32 (or bf16)
    w_t:   (Kp, Np) bf16   from prepare_fc_params
    b_row: (1, Np)  f32    from prepare_fc_params
    returns (B, out_features) float32
    """
    B, K = x.shape
    Kp, Np = w_t.shape
    N = out_features
    assert Kp == _round_up(K, 128), "w_t K-padding inconsistent with x"
    assert b_row.shape == (1, Np)

    # Tile selection: bf16 operands => 16-row sublane floor on M; N/K tiles are
    # 128-multiple divisors of the (already padded) weight dims -> no re-padding.
    tm = min(tm, _round_up(B, 16))
    Mp = _round_up(B, tm)
    tn = _divisor_tile(Np, tn, 128)
    tk = _divisor_tile(Kp, tk, 128)

    # v7x megacore: if there is only one M block, keep >= 2 N blocks when possible
    # so both TensorCores get work. Costs nothing on single-TC v5e/v6e.
    if Mp // tm == 1 and Np // tn < 2 and Np >= 256:
        tn = _divisor_tile(Np, Np // 2, 128)

    grid_m, grid_n, grid_k = Mp // tm, Np // tn, Kp // tk

    # Per-call activation cast/pad only (weight was padded once at prepare time).
    xp = x.astype(jnp.bfloat16)
    if (Mp, Kp) != (B, K):
        xp = jnp.pad(xp, ((0, Mp - B), (0, Kp - K)))

    cost = pl.CostEstimate(
        flops=2 * Mp * Np * Kp,
        transcendentals=0,
        bytes_accessed=(
            2 * Mp * Kp * grid_n      # bf16 x, re-read once per N block
            + 2 * Kp * Np * grid_m    # bf16 W, re-read once per M block
            + 4 * Mp * Np             # f32 output write
            + 4 * Np * grid_m         # f32 bias strips
        ),
    )

    out = pl.pallas_call(
        fc_relu_kernel,
        out_shape=jax.ShapeDtypeStruct((Mp, Np), jnp.float32),
        grid_spec=pltpu.PrefetchScalarGridSpec(
            num_scalar_prefetch=0,
            grid=(grid_m, grid_n, grid_k),
            in_specs=[
                pl.BlockSpec((tm, tk), lambda i, j, k: (i, k)),   # x tile (bf16)
                pl.BlockSpec((tk, tn), lambda i, j, k: (k, j)),   # W tile (bf16, K-major)
                pl.BlockSpec((1, tn), lambda i, j, k: (0, j)),    # bias strip (f32)
            ],
            out_specs=pl.BlockSpec((tm, tn), lambda i, j, k: (i, j)),
        ),
        compiler_params=pltpu.CompilerParams(
            dimension_semantics=("parallel", "parallel", "arbitrary"),
            vmem_limit_bytes=48 * 1024 * 1024,
        ),
        cost_estimate=cost,
    )(xp, w_t, b_row)

    return out[:B, :N]


def init_linear_params(key, in_features, out_features):
    """Deterministic init mirroring PyTorch nn.Linear default (uniform +/- 1/sqrt(in))."""
    kw, kb = jax.random.split(key)
    bound = 1.0 / jnp.sqrt(jnp.float32(in_features))
    weight = jax.random.uniform(
        kw, (out_features, in_features), jnp.float32, -bound, bound
    )
    bias = jax.random.uniform(kb, (out_features,), jnp.float32, -bound, bound)
    return weight, bias


def _ref_bf16(x, weight, bias):
    """Reference with the kernel's exact numerics: bf16 operands, f32 accumulation."""
    y = jnp.dot(
        x.astype(jnp.bfloat16),
        weight.T.astype(jnp.bfloat16),
        preferred_element_type=jnp.float32,
    ) + bias
    return jnp.maximum(y, 0.0)


def _ref_f32(x, weight, bias):
    return jnp.maximum(
        jnp.dot(x, weight.T, precision=jax.lax.Precision.HIGHEST) + bias, 0.0
    )


if __name__ == "__main__":
    key = jax.random.PRNGKey(0)
    k_x1, k_p1, k_x2, k_p2, k_x3, k_p3 = jax.random.split(key, 6)

    # Test 1: small shape consistent with the module's forward (Linear 32 -> 64 + ReLU).
    B, in_f, out_f = 8, 32, 64
    x = jax.random.normal(k_x1, (B, in_f), jnp.float32)
    w, b = init_linear_params(k_p1, in_f, out_f)
    w_t, b_row = prepare_fc_params(w, b)
    got = jax.block_until_ready(fc_layer(x, w_t, b_row, out_features=out_f))
    assert got.shape == (B, out_f)
    assert jnp.allclose(got, _ref_bf16(x, w, b), atol=2e-4, rtol=2e-4)
    assert jnp.allclose(got, _ref_f32(x, w, b), atol=5e-2, rtol=5e-2)

    # Test 2: multi-block grid on all three axes (exercises K accumulation + N padding).
    B2, in2, out2 = 96, 384, 320
    x2 = jax.random.normal(k_x2, (B2, in2), jnp.float32)
    w2, b2 = init_linear_params(k_p2, in2, out2)
    w2_t, b2_row = prepare_fc_params(w2, b2)
    got2 = jax.block_until_ready(
        fc_layer(x2, w2_t, b2_row, out_features=out2, tm=32, tn=128, tk=128)
    )
    assert got2.shape == (B2, out2)
    assert jnp.allclose(got2, _ref_bf16(x2, w2, b2), atol=2e-4, rtol=2e-4)
    assert jnp.allclose(got2, _ref_f32(x2, w2, b2), atol=5e-2, rtol=5e-2)

    # Test 3: ragged M/K/N with default tiles (exercises padding paths and the
    # small-batch tn split that keeps >= 2 parallel N blocks).
    B3, in3, out3 = 40, 200, 136
    x3 = jax.random.normal(k_x3, (B3, in3), jnp.float32)
    w3, b3 = init_linear_params(k_p3, in3, out3)
    w3_t, b3_row = prepare_fc_params(w3, b3)
    got3 = jax.block_until_ready(fc_layer(x3, w3_t, b3_row, out_features=out3))
    assert got3.shape == (B3, out3)
    assert jnp.allclose(got3, _ref_bf16(x3, w3, b3), atol=2e-4, rtol=2e-4)
    assert jnp.allclose(got3, _ref_f32(x3, w3, b3), atol=5e-2, rtol=5e-2)

    print("KERNEL_OK")
</pallas_src>

<mosaic_0001>
module attributes {stable_mosaic.version = 11 : i64} {
  func.func @fc_relu_kernel(%arg0: i32, %arg1: i32, %arg2: i32, %arg3: memref<16x128xbf16, #tpu.memory_space<vmem>>, %arg4: memref<128x128xbf16, #tpu.memory_space<vmem>>, %arg5: memref<1x128xf32, #tpu.memory_space<vmem>>, %arg6: memref<16x128xf32, #tpu.memory_space<vmem>>) attributes {dimension_semantics = [#tpu.dimension_semantics<parallel>, #tpu.dimension_semantics<parallel>, #tpu.dimension_semantics<arbitrary>], iteration_bounds = array<i64: 1, 1, 1>, scalar_prefetch = 0 : i64, scratch_operands = 0 : i64, tpu.core_type = #tpu.core_type<tc>, window_params = [{transform_indices = @transform_0, window_bounds = array<i64: 16, 128>}, {transform_indices = @transform_1, window_bounds = array<i64: 128, 128>}, {transform_indices = @transform_2, window_bounds = array<i64: 1, 128>}, {transform_indices = @transform_3, window_bounds = array<i64: 16, 128>}]} {
    %c0_i32 = arith.constant 0 : i32
    %0 = arith.cmpi eq, %arg2, %c0_i32 : i32
    %1 = arith.extui %0 : i1 to i32
    %c0_i32_0 = arith.constant 0 : i32
    %2 = arith.cmpi ne, %1, %c0_i32_0 : i32
    scf.if %2 {
      %cst_10 = arith.constant 0.000000e+00 : f32
      %12 = vector.broadcast %cst_10 : f32 to vector<16x128xf32>
      %c0_11 = arith.constant 0 : index
      %c0_12 = arith.constant 0 : index
      %13 = vector.load %arg6[%c0_11, %c0_12] : memref<16x128xf32, #tpu.memory_space<vmem>>, vector<16x128xf32>
      tpu.vector_store %arg6[%c0_11, %c0_12], %12 {strides = array<i32>} : memref<16x128xf32, #tpu.memory_space<vmem>>, vector<16x128xf32>,
    } else {
    }
    %c0 = arith.constant 0 : index
    %c0_1 = arith.constant 0 : index
    %3 = vector.load %arg6[%c0, %c0_1] : memref<16x128xf32, #tpu.memory_space<vmem>>, vector<16x128xf32>
    %c0_2 = arith.constant 0 : index
    %c0_3 = arith.constant 0 : index
    %4 = vector.load %arg3[%c0_2, %c0_3] : memref<16x128xbf16, #tpu.memory_space<vmem>>, vector<16x128xbf16>
    %c0_4 = arith.constant 0 : index
    %c0_5 = arith.constant 0 : index
    %5 = vector.load %arg4[%c0_4, %c0_5] : memref<128x128xbf16, #tpu.memory_space<vmem>>, vector<128x128xbf16>
    %cst = arith.constant dense<0.000000e+00> : vector<16x128xf32>
    %6 = tpu.matmul %4, %5, %cst {dimension_numbers = #tpu.dot_dimension_numbers<[1], [0], [0], [1], [0, 0, 1, 1], [], []>} : vector<16x128xbf16>, vector<128x128xbf16>, vector<16x128xf32> -> vector<16x128xf32>
    %7 = arith.addf %3, %6 : vector<16x128xf32>
    %c0_6 = arith.constant 0 : index
    %c0_7 = arith.constant 0 : index
    %8 = vector.load %arg6[%c0_6, %c0_7] : memref<16x128xf32, #tpu.memory_space<vmem>>, vector<16x128xf32>
    tpu.vector_store %arg6[%c0_6, %c0_7], %7 {strides = array<i32>} : memref<16x128xf32, #tpu.memory_space<vmem>>, vector<16x128xf32>,
    %c0_i32_8 = arith.constant 0 : i32
    %9 = arith.cmpi eq, %arg2, %c0_i32_8 : i32
    %10 = arith.extui %9 : i1 to i32
    %c0_i32_9 = arith.constant 0 : i32
    %11 = arith.cmpi ne, %10, %c0_i32_9 : i32
    scf.if %11 {
      %c0_10 = arith.constant 0 : index
      %c0_11 = arith.constant 0 : index
      %12 = vector.load %arg6[%c0_10, %c0_11] : memref<16x128xf32, #tpu.memory_space<vmem>>, vector<16x128xf32>
      %c0_12 = arith.constant 0 : index
      %c0_13 = arith.constant 0 : index
      %13 = vector.load %arg5[%c0_12, %c0_13] : memref<1x128xf32, #tpu.memory_space<vmem>>, vector<1x128xf32>
      %14 = vector.broadcast %13 : vector<1x128xf32> to vector<16x128xf32>
      %15 = arith.addf %12, %14 : vector<16x128xf32>
      %cst_14 = arith.constant 0.000000e+00 : f32
      %16 = vector.broadcast %cst_14 : f32 to vector<16x128xf32>
      %17 = arith.maximumf %15, %16 : vector<16x128xf32>
      %c0_15 = arith.constant 0 : index
      %c0_16 = arith.constant 0 : index
      %18 = vector.load %arg6[%c0_15, %c0_16] : memref<16x128xf32, #tpu.memory_space<vmem>>, vector<16x128xf32>
      tpu.vector_store %arg6[%c0_15, %c0_16], %17 {strides = array<i32>} : memref<16x128xf32, #tpu.memory_space<vmem>>, vector<16x128xf32>,
    } else {
    }
    return
  }
  func.func @transform_0(%arg0: i32, %arg1: i32, %arg2: i32) -> (i32, i32) {
    %c0_i32 = arith.constant 0 : i32
    return %arg0, %arg2 : i32, i32
  }
  func.func @transform_1(%arg0: i32, %arg1: i32, %arg2: i32) -> (i32, i32) {
    %c0_i32 = arith.constant 0 : i32
    return %arg2, %arg1 : i32, i32
  }
  func.func @transform_2(%arg0: i32, %arg1: i32, %arg2: i32) -> (i32, i32) {
    %c0_i32 = arith.constant 0 : i32
    %c0_i32_0 = arith.constant 0 : i32
    return %c0_i32, %arg1 : i32, i32
  }
  func.func @transform_3(%arg0: i32, %arg1: i32, %arg2: i32) -> (i32, i32) {
    %c0_i32 = arith.constant 0 : i32
    return %arg0, %arg1 : i32, i32
  }
}

</mosaic_0001>

<bundles_post_ra>
// kernel: fc_layer.1
= control target key start
LH: loop header
LB: loop body
LE: loop exit
PB: predicated region body
PF: predicated region fallthrough
CT: control target
= control target key end

     0   :  { %8 = vsyncpa [#allocation3], 0  ;;  %s254_s12 = smov [#allocation2]   ;;  %s303_s0 = inlined_call_operand.vmem [shape: bf16[16,128], index: 0, kind: input, shape index: {}]   ;;  %s304_s1 = inlined_call_operand.hbm [shape: bf16[128,128], index: 1, kind: input, shape index: {}]   ;;  %s305_s2 = inlined_call_operand.vmem [shape: f32[1,128], index: 2, kind: input, shape index: {}]   ;;  %s306_s3 = inlined_call_operand.vmem [shape: f32[16,128], index: 3, kind: output, shape index: {}]  }
   0x1   :  { %s16_s13 = sshll.u32 %s254_s12, 4  ;;  %s230_s16 = scalar_lea.hbm %s304_s1, 1024  ;;  %s17_s13 = int_to_ptr.vmem [resolvable:$true] %s16_s13 }
   0x2   :  { %p231_p0 = scmp.ne.s32.totalorder %s304_s1, %s230_s16  ;;  %p234_p1 = scmp.lt.u32.totalorder %s230_s16, %s304_s1 }
   0x4   :  { %p236_p2 = pnand %p234_p1, %p231_p0 }
   0x6   :  { %239 = shalt.err (!%p236_p2)
}
   0x7   :  { %s240_s21 = scalar_lea.vmem %s17_s13, 1024  ;;  %p245_p4 = scmp.lt.s32.totalorder %s17_s13, %s17_s13 }
   0x8   :  { %p241_p3 = scmp.ne.s32.totalorder %s17_s13, %s240_s21  ;;  %p246_p5 = scmp.lt.s32.totalorder %s240_s21, %s240_s21 }
   0xa   :  { %p247_p6 = por %p246_p5, %p245_p4 }
   0xc   :  { %p248_p7 = pnand %p247_p6, %p241_p3 }
   0xe   :  { %251 = shalt.err (!%p248_p7)
}
   0xf   :  { %s255_s22 = smov 64   ;;  %s256_s23 = smov 4  }
  0x10   :  { %22 = dma.hbm_to_vmem [thread:$0]  %s304_s1, 1024, %s17_s13, [#allocation3], %s255_s22, %s255_s22, %s256_s23  }
  0x11   :  { %252 = dma.done.wait [#allocation3], 1024  }
  0x12   :  { %253 = vsyncadd [#allocation3], 4294966272  ;;  %v257_v0 = vmov 0.0   ;;  %vm258_vm0 = vmmov 0   ;;  %v221_v1 = vld [vmem:[#allocation2] sm:$0xff]   ;;  %v222_v2 = vld [vmem:[#allocation2 + $0x8] sm:$0xff]  }
  0x13   :  { %196 = vmatprep.subr.bf16.mxu0 %v257_v0  ;;  %212 = vmatprep.mubr.msk.bf16.mxu0 %vm258_vm0, %v257_v0  ;;  %v223_v3 = vld [vmem:[#allocation2 + $0x10] sm:$0xff]   ;;  %v224_v4 = vld [vmem:[#allocation2 + $0x18] sm:$0xff]   ;;  %v225_v5 = vld [vmem:[#allocation2 + $0x20] sm:$0xff]  }
  0x14   :  { %197 = vmatpush3.bf16.msra.mxu0 %v221_v1  ;;  %v226_v6 = vld [vmem:[#allocation2 + $0x28] sm:$0xff]   ;;  %v227_v7 = vld [vmem:[#allocation2 + $0x30] sm:$0xff]   ;;  %v228_v8 = vld [vmem:[#allocation2 + $0x38] sm:$0xff]  }
  0x15   :  { %198 = vmatprep.subr.bf16.mxu0 %v257_v0  ;;  %v229_v9 = vld [vmem:[%s303_s0] sm:$0xff]  }
  0x16   :  { %v186_v11 = vld [vmem:[%s305_s2] ss:$0 sm:$0xff] }
  0x18   :  { %199 = vmatpush3.bf16.msra.mxu0 %v222_v2 }
  0x19   :  { %200 = vmatprep.subr.bf16.mxu0 %v257_v0 }
  0x1c   :  { %201 = vmatpush3.bf16.msra.mxu0 %v223_v3 }
  0x1d   :  { %202 = vmatprep.subr.bf16.mxu0 %v257_v0 }
  0x20   :  { %203 = vmatpush3.bf16.msra.mxu0 %v224_v4 }
  0x21   :  { %204 = vmatprep.subr.bf16.mxu0 %v257_v0 }
  0x24   :  { %205 = vmatpush3.bf16.msra.mxu0 %v225_v5 }
  0x25   :  { %206 = vmatprep.subr.bf16.mxu0 %v257_v0 }
  0x28   :  { %207 = vmatpush3.bf16.msra.mxu0 %v226_v6 }
  0x29   :  { %208 = vmatprep.subr.bf16.mxu0 %v257_v0 }
  0x2c   :  { %209 = vmatpush3.bf16.msra.mxu0 %v227_v7 }
  0x2d   :  { %210 = vmatprep.subr.bf16.mxu0 %v257_v0 }
  0x30   :  { %211 = vmatpush3.bf16.msra.mxu0 %v228_v8 }
  0x33   :  { %213 = vmatmul.mubr.bf16.vlgmr.msra.gmra.mrb[0].mxu0 %v229_v9 }
 0x106   :  { %v143_v10 = vpop.f32.mrb[0].mxu0 }
 0x107   :  { %v214_v12 = vpop.f32.mrb[1].mxu0  ;;  %v166_v14 = vadd.f32 %v186_v11, %v143_v10 }
 0x108   :  { %v146_v13 = vpop.f32.mrb[2].mxu0 }
 0x109   :  { %v215_v15 = vpop.f32.mrb[3].mxu0  ;;  %v168_v16 = vmax.f32 %v166_v14, 0.0  ;;  %v167_v17 = vadd.f32 %v186_v11, %v146_v13 }
 0x10b   :  { %170 = vst [vmem:[%s306_s3] sm:$0xff] %v168_v16  ;;  %v169_v18 = vmax.f32 %v167_v17, 0.0 }
 0x10d   :  { %171 = vst [vmem:[%s306_s3 + $0x8] sm:$0xff] %v169_v18 }
 0x10e   :  { %176 = vsyncpa [#allocation3], 1 }

</bundles_post_ra>
